<compile_context>
chip_gen: v7x
topology: tpu7x:2x2x1
jax: 0.10.0
libtpu: 0.0.40
codegen_flags: <defaults>
</compile_context>

<pallas_src>
import jax
import jax.numpy as jnp
from jax.experimental import pallas as pl
from jax.experimental.pallas import tpu as pltpu


_LANE = 128
_MAX_LANES = 32768            # wide, 128-aligned lane axis -> unmasked stores
_TILE_BYTES_TARGET = 4 << 20  # ~4 MiB per buffer; ~16 MiB VMEM with in/out x2 buffering


def _copy_kernel(x_ref, o_ref):
    # Degenerate "hot path": the reference block performs no computation,
    # so the kernel is a pure VMEM pass-through of its tile.
    o_ref[...] = x_ref[...]


def _choose_layout(total_elems, itemsize):
    """Pick a lane-dense (rows, lanes) flattening and a row-tile size.

    Returns (rows, lanes, tile_rows) or None if no clean 128-aligned layout
    exists (in which case the no-op block just returns its input).
    """
    # Largest lane width that is a multiple of 128, divides the element count,
    # and is capped so a single row stays comfortably inside a tile.
    lanes = 0
    cand = _MAX_LANES
    while cand >= _LANE:
        if total_elems % cand == 0:
            lanes = cand
            break
        cand //= 2
    if lanes == 0:
        return None
    rows = total_elems // lanes

    row_bytes = lanes * itemsize
    target_rows = max(8, _TILE_BYTES_TARGET // row_bytes)
    if rows <= target_rows:
        # Whole array in one block: always layout-legal (block == full dims).
        tile_rows = rows
    else:
        # Largest multiple of 8 that divides rows and fits the byte target.
        tile_rows = 0
        t = (target_rows // 8) * 8
        while t >= 8:
            if rows % t == 0:
                tile_rows = t
                break
            t -= 8
        if tile_rows == 0:
            # No clean multiple-of-8 divisor: use the whole array if it fits a
            # conservative VMEM budget (v7x-safe), otherwise skip the kernel.
            if rows * row_bytes <= (12 << 20):
                tile_rows = rows
            else:
                return None
    return rows, lanes, tile_rows


def spdnorm_hard_block_kernel(x):
    """Runs the (no-op) SPDNormHardBlock body as a Pallas TPU kernel.

    x: [B, C, H, W] float32 (NCHW). Returns x unchanged (identity), computed
    through a row-tiled, output-aliased pallas_call.
    """
    layout = _choose_layout(x.size, x.dtype.itemsize)
    if layout is None:
        # TODO(synk): element count not 128-divisible — the reference block is
        # a no-op, so return the input untouched instead of padding.
        return x

    rows, lanes, tile_rows = layout
    x2 = x.reshape(rows, lanes)

    out2 = pl.pallas_call(
        _copy_kernel,
        out_shape=jax.ShapeDtypeStruct((rows, lanes), x2.dtype),
        grid=(rows // tile_rows,),
        in_specs=[pl.BlockSpec((tile_rows, lanes), lambda i: (i, 0))],
        out_specs=pl.BlockSpec((tile_rows, lanes), lambda i: (i, 0)),
        # Output aliases the input buffer: no separate HBM output allocation;
        # with a donated input this removes the write-side traffic entirely.
        input_output_aliases={0: 0},
        compiler_params=pltpu.CompilerParams(
            # "parallel" lets v7x's two TensorCores split the row tiles;
            # measured-neutral on single-TC v5e/v6e.
            dimension_semantics=("parallel",),
        ),
    )(x2)

    return out2.reshape(x.shape)


# Jitted entry point (keeps the aliasing inside one XLA program).
_spdnorm_hard_block_jit = jax.jit(spdnorm_hard_block_kernel)


class SPDNormHardBlock:
    """JAX/Pallas mirror of the PyTorch SPDNormHardBlock."""

    def __init__(self):
        # Reference __init__ declares no parameters.
        pass

    def forward(self):
        # Reference forward: `pass` -> returns None, takes no inputs.
        return None


if __name__ == "__main__":
    # Exercise the module exactly as defined (no-arg forward, returns None).
    block = SPDNormHardBlock()
    result = block.forward()
    assert result is None

    # Exercise the Pallas kernel path once on small deterministic data.
    key = jax.random.PRNGKey(0)
    x = jax.random.normal(key, (2, 4, 16, 16), dtype=jnp.float32)  # NCHW
    y = _spdnorm_hard_block_jit(x)
    y = jax.block_until_ready(y)

    # Identity semantics check.
    assert y.shape == x.shape
    assert bool(jnp.allclose(y, x))

    print("KERNEL_OK")
</pallas_src>

<mosaic_0001>
module attributes {stable_mosaic.version = 11 : i64} {
  func.func @_copy_kernel(%arg0: i32, %arg1: memref<1x2048xf32, #tpu.memory_space<vmem>>, %arg2: memref<1x2048xf32, #tpu.memory_space<vmem>>) attributes {dimension_semantics = [#tpu.dimension_semantics<parallel>], iteration_bounds = array<i64: 1>, scalar_prefetch = 0 : i64, scratch_operands = 0 : i64, tpu.core_type = #tpu.core_type<tc>, window_params = [{transform_indices = @transform_0, window_bounds = array<i64: 1, 2048>}, {transform_indices = @transform_1, window_bounds = array<i64: 1, 2048>}]} {
    %c0 = arith.constant 0 : index
    %c0_0 = arith.constant 0 : index
    %0 = vector.load %arg1[%c0, %c0_0] : memref<1x2048xf32, #tpu.memory_space<vmem>>, vector<1x2048xf32>
    %c0_1 = arith.constant 0 : index
    %c0_2 = arith.constant 0 : index
    %1 = vector.load %arg2[%c0_1, %c0_2] : memref<1x2048xf32, #tpu.memory_space<vmem>>, vector<1x2048xf32>
    tpu.vector_store %arg2[%c0_1, %c0_2], %0 {strides = array<i32>} : memref<1x2048xf32, #tpu.memory_space<vmem>>, vector<1x2048xf32>,
    return
  }
  func.func @transform_0(%arg0: i32) -> (i32, i32) {
    %c0_i32 = arith.constant 0 : i32
    %c0_i32_0 = arith.constant 0 : i32
    return %arg0, %c0_i32 : i32, i32
  }
  func.func @transform_1(%arg0: i32) -> (i32, i32) {
    %c0_i32 = arith.constant 0 : i32
    %c0_i32_0 = arith.constant 0 : i32
    return %arg0, %c0_i32 : i32, i32
  }
}

</mosaic_0001>

<bundles_post_ra>
// kernel: spdnorm_hard_block_kernel.1
= control target key start
LH: loop header
LB: loop body
LE: loop exit
PB: predicated region body
PF: predicated region fallthrough
CT: control target
= control target key end

     0   :  { %s38_s0 = inlined_call_operand.vmem [shape: f32[1,2048], index: 0, kind: input, shape index: {}, may-alias: {0,1}]   ;;  %s39_s1 = inlined_call_operand.vmem [shape: f32[1,2048], index: 1, kind: output, shape index: {}, may-alias: {0,1}]  }
   0x1   :  { %v8_v0 = vld [vmem:[%s38_s0] sm:$0xff]  ;;  %v9_v1 = vld [vmem:[%s38_s0 + $0x8] sm:$0xff] }
   0x2   :  { %10 = vst [vmem:[%s39_s1] sm:$0xff] %v8_v0  ;;  %11 = vst [vmem:[%s39_s1 + $0x8] sm:$0xff] %v9_v1 }

</bundles_post_ra>
